<compile_context>
chip_gen: v6e
topology: v6e:2x2x1
jax: 0.10.0
libtpu: 0.0.40
codegen_flags: <defaults>
</compile_context>

<pallas_src>
import jax
import jax.numpy as jnp
import numpy as np
from jax.experimental import pallas as pl
from jax.experimental.pallas import tpu as pltpu


def _copy_kernel(enc_ref, out_ref):
    # Output block has a Squeezed leading batch dim, so both refs are
    # (row_block, lanes): a straight, unmasked tile copy.
    out_ref[...] = enc_ref[...]


def trainable_position_encoding_forward(x, encodings):
    """Returns encodings repeated over x's batch dim: [B, S, C]."""
    batch_size = x.shape[0]
    seq, ch = encodings.shape
    flat = seq * ch
    itemsize = np.dtype(encodings.dtype).itemsize

    if flat % 128 == 0:
        # Lane-dense layout: last dim is exactly 128 lanes -> unmasked stores.
        lanes = 128
        rows = flat // lanes
        enc2d = encodings.reshape(rows, lanes)  # contiguous reshape: free
    else:
        # Fallback layout (stores may be lane-masked if ch < 128).
        rows, lanes = seq, ch
        enc2d = encodings

    # Choose a row chunk: full table when small, else a multi-MiB block
    # (multiple of 8 sublanes) so double-buffered in/out blocks stay well
    # inside the scoped-VMEM default on v5e/v6e/v7x.
    target_bytes = 4 << 20
    row_bytes = lanes * itemsize
    if rows * row_bytes <= target_bytes or rows <= 8:
        row_block = rows
    else:
        row_block = int(max(8, min(rows, (target_bytes // row_bytes) // 8 * 8)))
    n_row_chunks = pl.cdiv(rows, row_block)

    out_flat = pl.pallas_call(
        _copy_kernel,
        out_shape=jax.ShapeDtypeStruct((batch_size, rows, lanes),
                                       encodings.dtype),
        grid_spec=pltpu.PrefetchScalarGridSpec(
            num_scalar_prefetch=0,
            grid=(batch_size, n_row_chunks),
            in_specs=[
                # Same table row-chunk for every batch index.
                pl.BlockSpec((row_block, lanes), lambda b, r: (r, 0)),
            ],
            out_specs=pl.BlockSpec((pl.Squeezed(), row_block, lanes),
                                   lambda b, r: (b, r, 0)),
        ),
        compiler_params=pltpu.CompilerParams(
            # Every grid step is independent -> both axes parallel (megacore).
            dimension_semantics=("parallel", "parallel"),
        ),
    )(enc2d)

    # Free contiguous reshape back to the module's output layout.
    return out_flat.reshape(batch_size, seq, ch)


def init_encodings(key, index_dims, num_enc_channels, init_scale=0.02,
                   dtype=jnp.float32):
    """Deterministic init matching nn.init.trunc_normal_(std=init_scale)."""
    if not isinstance(index_dims, int) and len(index_dims) > 1:
        index_dims = int(np.prod(index_dims))
    elif not isinstance(index_dims, int):
        index_dims = int(index_dims[0])
    # trunc_normal_ truncates at +/-2 (absolute); with std=0.02 this matches a
    # standard truncated normal scaled by std for all practical purposes.
    sample = jax.random.truncated_normal(
        key, lower=-2.0, upper=2.0, shape=(index_dims, num_enc_channels),
        dtype=jnp.float32)
    return (sample * init_scale).astype(dtype)


if __name__ == "__main__":
    key = jax.random.PRNGKey(0)
    k_enc, k_x = jax.random.split(key)

    # Small shapes: x is NCHW [2, 4, 16, 16]; index_dims = (16, 16) -> S = 256.
    batch, in_ch, H, W = 2, 4, 16, 16
    num_enc_channels = 32
    index_dims = (H, W)

    x = jax.random.normal(k_x, (batch, in_ch, H, W), dtype=jnp.float32)
    encodings = init_encodings(k_enc, index_dims, num_enc_channels,
                               init_scale=0.02)

    out = trainable_position_encoding_forward(x, encodings)
    out = jax.block_until_ready(out)

    # Reference check: pure-JAX broadcast of the parameter table.
    ref = jnp.broadcast_to(encodings[None, :, :], (batch,) + encodings.shape)
    assert out.shape == (batch, H * W, num_enc_channels), out.shape
    assert out.dtype == encodings.dtype
    np.testing.assert_allclose(np.asarray(out), np.asarray(ref), rtol=0, atol=0)

    print("KERNEL_OK")
</pallas_src>

<mosaic_0001>
module attributes {stable_mosaic.version = 11 : i64} {
  func.func @_copy_kernel(%arg0: i32, %arg1: i32, %arg2: memref<64x128xf32, #tpu.memory_space<vmem>>, %arg3: memref<1x64x128xf32, #tpu.memory_space<vmem>>) attributes {dimension_semantics = [#tpu.dimension_semantics<parallel>, #tpu.dimension_semantics<parallel>], iteration_bounds = array<i64: 2, 1>, scalar_prefetch = 0 : i64, scratch_operands = 0 : i64, tpu.core_type = #tpu.core_type<tc>, window_params = [{transform_indices = @transform_0, window_bounds = array<i64: 64, 128>}, {transform_indices = @transform_1, window_bounds = array<i64: 1, 64, 128>}]} {
    %c0 = arith.constant 0 : index
    %c0_0 = arith.constant 0 : index
    %0 = vector.load %arg2[%c0, %c0_0] : memref<64x128xf32, #tpu.memory_space<vmem>>, vector<64x128xf32>
    %c0_1 = arith.constant 0 : index
    %c0_2 = arith.constant 0 : index
    %c0_3 = arith.constant 0 : index
    %1 = vector.load %arg3[%c0_1, %c0_2, %c0_3] : memref<1x64x128xf32, #tpu.memory_space<vmem>>, vector<1x64x128xf32>
    %2 = vector.shape_cast %1 : vector<1x64x128xf32> to vector<64x128xf32>
    %3 = vector.shape_cast %0 : vector<64x128xf32> to vector<1x64x128xf32>
    tpu.vector_store %arg3[%c0_1, %c0_2, %c0_3], %3 {strides = array<i32>} : memref<1x64x128xf32, #tpu.memory_space<vmem>>, vector<1x64x128xf32>,
    return
  }
  func.func @transform_0(%arg0: i32, %arg1: i32) -> (i32, i32) {
    %c0_i32 = arith.constant 0 : i32
    %c0_i32_0 = arith.constant 0 : i32
    return %arg1, %c0_i32 : i32, i32
  }
  func.func @transform_1(%arg0: i32, %arg1: i32) -> (i32, i32, i32) {
    %c0_i32 = arith.constant 0 : i32
    %c0_i32_0 = arith.constant 0 : i32
    return %arg0, %arg1, %c0_i32 : i32, i32, i32
  }
}

</mosaic_0001>

<bundles_post_ra>
// kernel: tpu_custom_call.1
= control target key start
LH: loop header
LB: loop body
LE: loop exit
PB: predicated region body
PF: predicated region fallthrough
CT: control target
= control target key end

     0   :  { %6 = vsyncpa [#allocation3], 0  ;;  %s578_s0 = inlined_call_operand.hbm [shape: f32[64,128], index: 0, kind: input, shape index: {}]   ;;  %s579_s1 = inlined_call_operand.hbm [shape: f32[2,64,128], index: 1, kind: output, shape index: {}]  }
   0x1   :  { %7 = vsyncpa [#allocation4], 0 }
   0x2   :  { %9 = vsyncpa [#allocation4 + $0x1], 0  ;;  %s448_s6 = smov 0   ;;  %s450_s7 = smov 0  }
   0x3   :  { %s452_s8 = smov 0   ;;  %s454_s9 = smov 0  }
   0x4   :  { %s456_s10 = smov 0   ;;  %s458_s11 = smov 0  }
   0x5 LB: > { %s241_s12 = sadd.s32 4294967295, %s430_s11   ;;  %s242_s13 = sadd.s32 4294967294, %s430_s11   ;;  %s430_s11 = sphi %s458_s11, %s15_s11   ;;  %s426_s10 = sphi %s456_s10, %s588_s10   ;;  %s422_s9 = sphi %s454_s9, %s587_s9   ;;  %s418_s8 = sphi %s452_s8, %s586_s8   ;;  %s414_s7 = sphi %s450_s7, %s585_s7   ;;  %s410_s6 = sphi %s448_s6, %s584_s6  }
   0x6   : > { %s27_s14 = sadd.s32 1, %s426_s10  ;;  %s62_s15 = sadd.s32 1, %s418_s8 }
   0x7   : > { %p29_p0 = scmp.ge.s32.totalorder %s27_s14, 2  ;;  %p72_p1 = scmp.ne.s32.totalorder %s418_s8, %s414_s7 }
   0x8   : > { %p73_p2 = scmp.eq.s32.totalorder %s241_s12, 1  ;;  %p78_p3 = scmp.ne.s32.totalorder %s414_s7, %s410_s6 }
   0x9   : > { %s590_s14 = smov (%p29_p0, %s27_s14), 0  ;;  %p79_p5 = scmp.eq.s32.totalorder %s242_s13, 1 }
   0xa   : > { %p488_p4 = por %p73_p2, %p72_p1  ;;  %s57_s17 = ssub.s32 %s426_s10, %s590_s14 }
   0xb   : > { %p243_p6 = scmp.ge.s32.totalorder %s430_s11, 1  ;;  %p60_p7 = scmp.eq.s32.totalorder %s57_s17, 0 }
   0xc   : > { %p495_p8 = por %p79_p5, %p78_p3  ;;  %p86_p9 = scmp.lt.s32.totalorder %s430_s11, 3 }
   0xd   : > { %s501_s19 = scalar_select %p60_p7, %s418_s8, %s62_s15  }
   0xe   : > { %p503_p10 = pnand %p243_p6, %p86_p9  ;;  %p507_p11 = scmp.eq.s32.totalorder %s241_s12, 0 }
   0xf   : > { %s432_s22 = smov [#allocation2]  }
  0x10   : > { %p260_p12 = pneg %p503_p10  ;;  %s101_s23 = sshll.u32 %s432_s22, 4  ;;  %s102_s23 = int_to_ptr.vmem [resolvable:$true] %s101_s23 }
  0x11   : > { %s335_s24 = scalar_lea.vmem %s102_s23, 1024  ;;  %p343_p5 = scmp.lt.s32.totalorder %s102_s23, %s102_s23 }
  0x12   : > { %p261_p13 = pnand %p507_p11, %p260_p12  ;;  %p336_p1 = scmp.ne.s32.totalorder %s102_s23, %s335_s24 }
  0x13   : > { %p344_p6 = scmp.lt.s32.totalorder %s335_s24, %s335_s24 }
  0x14   : > { %p326_p0 = pneg %p261_p13 }
  0x15   : > { %p345_p7 = por %p344_p6, %p343_p5 }
  0x16   : > { %p338_p2 = pnand %p336_p1, %p326_p0 }
  0x18   : > { %p339_p3 = pneg %p338_p2 }
  0x1a   : > { %p346_p9 = pnand %p345_p7, %p339_p3 }
  0x1c   : > { %349 = shalt.err (!%p346_p9)
}
  0x1d   : > { %s433_s25 = smov 128   ;;  %s434_s26 = smov 8  }
  0x1e   : > { %263 = dma.hbm_to_vmem [thread:$0]  (!%p261_p13), %s578_s0, 1024, %s102_s23, [#allocation3], %s433_s25, %s433_s25, %s434_s26  }
  0x1f   : > { %117 = sbr.rel (%p503_p10) target bundleno = 63 (0x3f), region = 24 }
  0x24   : > { %401 = dma.done.wait (%p507_p11), [#allocation3], 1024  }
  0x25   : > { %403 = vsyncadd (%p507_p11), [#allocation3], 4294966272  ;;  %s129_s29 = sand.u32 1, %s414_s7   ;;  %s253_s2 = sshll.u32 %s422_s9, 10  ;;  %v134_v0 = vld [vmem:[#allocation2] sm:$0xff]  ;;  %v135_v1 = vld [vmem:[#allocation2 + $0x8] sm:$0xff] }
  0x26   : > { %s247_s30 = sshll.u32 %s129_s29, 6  ;;  %v136_v2 = vld [vmem:[#allocation2 + $0x10] sm:$0xff]  ;;  %s529_s13 = scalar_lea.hbm %s579_s1, %s253_s2  ;;  %v137_v3 = vld [vmem:[#allocation2 + $0x18] sm:$0xff]  ;;  %v138_v4 = vld [vmem:[#allocation2 + $0x20] sm:$0xff] }
  0x27   : > { %s131_s3 = scalar_lea.vmem [#allocation5], %s247_s30  ;;  %v139_v5 = vld [vmem:[#allocation2 + $0x28] sm:$0xff]  ;;  %v140_v6 = vld [vmem:[#allocation2 + $0x30] sm:$0xff]  ;;  %v141_v7 = vld [vmem:[#allocation2 + $0x38] sm:$0xff]  ;;  %s533_s9 = scalar_lea.sflag [#allocation4], %s129_s29 }
  0x28   : > { %s166_s4 = sshll.u32 %s131_s3, 4  ;;  %142 = vst [vmem:[%s131_s3] sm:$0xff] %v134_v0  ;;  %143 = vst [vmem:[%s131_s3 + $0x8] sm:$0xff] %v135_v1  ;;  %s435_s17 = smov [#allocation5]   ;;  %s531_s4 = int_to_ptr.vmem [resolvable:$true] %s166_s4 }
  0x29   : > { %144 = vst [vmem:[%s131_s3 + $0x10] sm:$0xff] %v136_v2  ;;  %145 = vst [vmem:[%s131_s3 + $0x18] sm:$0xff] %v137_v3  ;;  %s350_s15 = scalar_lea.vmem %s531_s4, 1024  ;;  %s354_s20 = sshll.u32 %s435_s17, 4  ;;  %s355_s20 = int_to_ptr.vmem [resolvable:$false] %s354_s20 }
  0x2a   : > { %146 = vst [vmem:[%s131_s3 + $0x20] sm:$0xff] %v138_v4  ;;  %147 = vst [vmem:[%s131_s3 + $0x28] sm:$0xff] %v139_v5  ;;  %p351_p10 = scmp.ne.s32.totalorder %s531_s4, %s350_s15  ;;  %s356_s21 = scalar_lea.vmem %s355_s20, 2048 }
  0x2b   : > { %148 = vst [vmem:[%s131_s3 + $0x30] sm:$0xff] %v140_v6  ;;  %149 = vst [vmem:[%s131_s3 + $0x38] sm:$0xff] %v141_v7  ;;  %p357_p13 = scmp.lt.s32.totalorder %s531_s4, %s355_s20  ;;  %p358_p0 = scmp.lt.s32.totalorder %s356_s21, %s350_s15 }
  0x2c   : > { %p352_p11 = pnand %p351_p10, %p488_p4 }
  0x2d   : > { %p359_p1 = por %p358_p0, %p357_p13 }
  0x2e   : > { %p353_p12 = pneg %p352_p11 }
  0x30   : > { %p360_p2 = pnand %p359_p1, %p353_p12 }
  0x32   : > { %363 = shalt.err (!%p360_p2)
}
  0x33   : > { %s364_s22 = scalar_lea.hbm %s529_s13, 1024  ;;  %s368_s25 = scalar_lea.hbm %s579_s1, 2048 }
  0x34   : > { %p365_p3 = scmp.ne.s32.totalorder %s529_s13, %s364_s22  ;;  %p369_p7 = scmp.lt.s32.totalorder %s529_s13, %s579_s1 }
  0x35   : > { %p370_p9 = scmp.lt.s32.totalorder %s368_s25, %s364_s22 }
  0x36   : > { %p366_p5 = pnand %p365_p3, %p488_p4 }
  0x37   : > { %p371_p10 = por %p370_p9, %p369_p7 }
  0x38   : > { %p367_p6 = pneg %p366_p5 }
  0x3a   : > { %p372_p11 = pnand %p371_p10, %p367_p6 }
  0x3c   : > { %375 = shalt.err (!%p372_p11)
}
  0x3d   : > { %s436_s28 = smov 128   ;;  %s437_s29 = smov 8  }
  0x3e   : > { %258 = dma.vmem_to_hbm [thread:$0]  (%p488_p4), %s531_s4, 1024, %s529_s13, %s533_s9, %s436_s28, %s436_s28, %s437_s29  }
  0x3f PF: > { %p270_p12 = scmp.ge.s32.totalorder %s430_s11, 2  ;;  %s181_s30 = sand.u32 1, %s410_s6  }
  0x40   : > { %s182_s2 = scalar_lea.sflag [#allocation4], %s181_s30 }
  0x41   : > { %p265_p13 = pnand %p270_p12, %p495_p8 }
  0x43   : > { %p266_p0 = pneg %p265_p13 }
  0x45   : > { %405 = dma.done.wait (%p266_p0), %s182_s2, 1024  }
  0x46   : > { %407 = vsyncadd (%p266_p0), %s182_s2, 4294966272  ;;  %s15_s11 = sadd.s32 1, %s430_s11   ;;  %s584_s6 = smov %s414_s7 }
  0x47   : > { %p12_p1 = scmp.ge.s32.totalorder %s15_s11, 4   ;;  %s585_s7 = smov %s418_s8 }
  0x48   : > { %s586_s8 = smov %s501_s19  ;;  %s587_s9 = smov %s426_s10 }
  0x49   : > { %s588_s10 = smov %s590_s14  ;;  %14 = sbr.rel (!%p12_p1) target bundleno = 5 (0x5), region = 62 }
  0x4e   :  { %187 = vsyncpa [#allocation3], 1 }
  0x4f   :  { %189 = vsyncpa [#allocation3 + $0x1], 1 }
  0x50   :  { %190 = vsyncpa [#allocation4], 1 }
  0x51   :  { %192 = vsyncpa [#allocation4 + $0x1], 1 }

</bundles_post_ra>
